<compile_context>
chip_gen: v6e
topology: v6e:2x2x1
jax: 0.10.0
libtpu: 0.0.40
codegen_flags: <defaults>
</compile_context>

<pallas_src>
import jax
import jax.numpy as jnp
from jax.experimental import pallas as pl
from jax.experimental.pallas import tpu as pltpu

_EPSILON = 1e-06


def _round_up(x, m):
    return ((x + m - 1) // m) * m


def _vmem_limit_bytes():
    """Half the physical VMEM, capped at 64 MiB (v5e/v6e: 128->64, v7x: 64->32)."""
    try:
        cap = int(pltpu.get_tpu_info().vmem_capacity_bytes)
    except Exception:
        cap = 64 * 1024 * 1024
    return max(16 * 1024 * 1024, min(cap // 2, 64 * 1024 * 1024))


def _pick_tiles(rows, hw, k_itemsizes, em_per_row, em_itemsizes, vmem_limit):
    """Choose (row_tile, hw_chunk) to fill ~60% of the scoped-VMEM budget."""
    # Spatial chunk: full H*W when it fits, else the largest multiple-of-128
    # divisor of H*W below the cap (decouples tile size from heatmap size).
    max_chunk_lanes = 32768
    if hw <= max_chunk_lanes:
        hw_chunk = hw
    else:
        m = hw // 128
        hw_chunk = 128
        for c in range(max_chunk_lanes // 128, 0, -1):
            if m % c == 0:
                hw_chunk = c * 128
                break

    budget = int(vmem_limit * 0.6)
    per_row = (2 * hw_chunk * k_itemsizes        # 2 pipeline buffers x heatmap pred+true
               + 2 * em_per_row * em_itemsizes   # 2 pipeline buffers x emb pred+true
               + 2 * 4                           # tp/sq f32 accumulators
               + 2 * 2 * 4)                      # 2 buffers x 2 f32 outputs
    row_tile = max(8, (budget // max(per_row, 1)) // 8 * 8)
    row_tile = min(row_tile, _round_up(rows, 8))
    return row_tile, hw_chunk


def _joint_kernel(kp_ref, kt_ref, ep_ref, et_ref, ratio_ref, l1_ref,
                  tp_acc, sq_acc):
    j = pl.program_id(1)  # spatial (H*W) chunk index -- reduction axis

    @pl.when(j == 0)
    def _():
        tp_acc[...] = jnp.zeros_like(tp_acc)
        sq_acc[...] = jnp.zeros_like(sq_acc)

    # Cast AFTER the (possibly bf16) DMA -- keeps HBM traffic at native width.
    p = jax.nn.sigmoid(kp_ref[...].astype(jnp.float32))
    t = kt_ref[...].astype(jnp.float32)
    d = t - p
    # t^2 + p^2 - t*p == (t - p)^2 + t*p  -> only two lane reductions needed.
    tp_acc[...] += jnp.sum(t * p, axis=1, keepdims=True)
    sq_acc[...] += jnp.sum(d * d, axis=1, keepdims=True)

    @pl.when(j == pl.num_programs(1) - 1)
    def _():
        tp = tp_acc[...]
        ratio_ref[...] = (tp + _EPSILON) / (tp + sq_acc[...] + _EPSILON)
        # Fused L1(tanh) term: per-row partial sums of |tanh(pred) - true|.
        ep = jnp.tanh(ep_ref[...].astype(jnp.float32))
        et = et_ref[...].astype(jnp.float32)
        l1_ref[...] = jnp.sum(jnp.abs(ep - et), axis=1, keepdims=True)


def joint_loss(k_pred, em_pred, k_true, em_true):
    B, C, H, W = k_pred.shape
    assert k_true.shape == k_pred.shape
    rows = B * C
    hw = H * W
    assert hw % 128 == 0, "H*W must be a multiple of 128 for lane alignment"

    # Native-dtype views (reshape only, no cast -> no extra HBM pass).
    kp = k_pred.reshape(rows, hw)
    kt = k_true.reshape(rows, hw)

    ep = em_pred.reshape(-1)
    et = em_true.reshape(-1)
    assert ep.shape == et.shape, "pred / flattened target size mismatch"
    n_em = ep.shape[0]

    # Lay the (small) embeddings out as a few lanes per heatmap row so the L1
    # term rides along with the row-parallel grid.
    em_per_row = _round_up(-(-n_em // rows), 128)

    vmem_limit = _vmem_limit_bytes()
    row_tile, hw_chunk = _pick_tiles(
        rows, hw,
        kp.dtype.itemsize + kt.dtype.itemsize,
        em_per_row,
        ep.dtype.itemsize + et.dtype.itemsize,
        vmem_limit)

    rows_padded = _round_up(rows, row_tile)
    if rows_padded != rows:
        kp = jnp.pad(kp, ((0, rows_padded - rows), (0, 0)))
        kt = jnp.pad(kt, ((0, rows_padded - rows), (0, 0)))

    em_cap = rows_padded * em_per_row
    ep2 = jnp.pad(ep, (0, em_cap - n_em)).reshape(rows_padded, em_per_row)
    et2 = jnp.pad(et, (0, em_cap - n_em)).reshape(rows_padded, em_per_row)

    grid = (rows_padded // row_tile, hw // hw_chunk)

    ratios, l1rows = pl.pallas_call(
        _joint_kernel,
        out_shape=(jax.ShapeDtypeStruct((rows_padded, 1), jnp.float32),
                   jax.ShapeDtypeStruct((rows_padded, 1), jnp.float32)),
        grid_spec=pltpu.PrefetchScalarGridSpec(
            num_scalar_prefetch=0,
            grid=grid,
            in_specs=[
                pl.BlockSpec((row_tile, hw_chunk), lambda i, j: (i, j)),
                pl.BlockSpec((row_tile, hw_chunk), lambda i, j: (i, j)),
                pl.BlockSpec((row_tile, em_per_row), lambda i, j: (i, 0)),
                pl.BlockSpec((row_tile, em_per_row), lambda i, j: (i, 0)),
            ],
            out_specs=(
                pl.BlockSpec((row_tile, 1), lambda i, j: (i, 0)),
                pl.BlockSpec((row_tile, 1), lambda i, j: (i, 0)),
            ),
            scratch_shapes=[pltpu.VMEM((row_tile, 1), jnp.float32),
                            pltpu.VMEM((row_tile, 1), jnp.float32)],
        ),
        compiler_params=pltpu.CompilerParams(
            dimension_semantics=("parallel", "arbitrary"),
            vmem_limit_bytes=vmem_limit,
        ),
    )(kp, kt, ep2, et2)

    # Tiny fused XLA epilogue: final means over B*C rows / n_em elements.
    iou = jnp.float32(1.0) - jnp.sum(ratios[:rows, 0]) / jnp.float32(rows)
    l1 = jnp.sum(l1rows[:, 0]) / jnp.float32(n_em)
    return iou, l1


joint_loss_jit = jax.jit(joint_loss)


def _reference(k_pred, em_pred, k_true, em_true):
    # Pure-JAX reference mirroring the PyTorch module semantics (f32).
    p = jax.nn.sigmoid(k_pred.astype(jnp.float32))
    t = k_true.astype(jnp.float32)
    op_sum = lambda x: x.sum(axis=(2, 3))
    tp = op_sum(t * p)
    ratio = (tp + _EPSILON) / (op_sum(t ** 2) + op_sum(p ** 2) - tp + _EPSILON)
    iou = 1.0 - jnp.mean(ratio)
    l1 = jnp.mean(jnp.abs(jnp.tanh(em_pred.astype(jnp.float32)).reshape(-1)
                          - em_true.astype(jnp.float32).reshape(-1)))
    return iou, l1


if __name__ == "__main__":
    key = jax.random.PRNGKey(0)
    k1, k2, k3, k4 = jax.random.split(key, 4)

    # Keypoint heatmaps: NCHW, batch=2, channels=4, spatial=16x16.
    k_pred = jax.random.normal(k1, (2, 4, 16, 16), dtype=jnp.float32)
    k_true = (jax.random.uniform(k2, (2, 4, 16, 16), dtype=jnp.float32) > 0.7).astype(
        jnp.float32)

    # Embeddings: predictions are flat (256,), targets are (2, 128).
    em_pred = jax.random.normal(k3, (256,), dtype=jnp.float32)
    em_true = jax.random.normal(k4, (2, 128), dtype=jnp.float32)

    # f32 path
    iou, l1 = joint_loss_jit(k_pred, em_pred, k_true, em_true)
    jax.block_until_ready((iou, l1))
    iou_ref, l1_ref = _reference(k_pred, em_pred, k_true, em_true)
    assert jnp.allclose(iou, iou_ref, atol=1e-5, rtol=1e-5), (iou, iou_ref)
    assert jnp.allclose(l1, l1_ref, atol=1e-5, rtol=1e-5), (l1, l1_ref)

    # bf16 path: heatmaps/embeddings are DMA'd as bf16 and cast in-VMEM.
    iou_b, l1_b = joint_loss_jit(k_pred.astype(jnp.bfloat16),
                                 em_pred.astype(jnp.bfloat16),
                                 k_true.astype(jnp.bfloat16),
                                 em_true.astype(jnp.bfloat16))
    jax.block_until_ready((iou_b, l1_b))
    assert jnp.allclose(iou_b, iou_ref, atol=2e-2, rtol=2e-2), (iou_b, iou_ref)
    assert jnp.allclose(l1_b, l1_ref, atol=2e-2, rtol=2e-2), (l1_b, l1_ref)

    print("KERNEL_OK")
</pallas_src>

<mosaic_0001>
module attributes {stable_mosaic.version = 11 : i64} {
  func.func @_joint_kernel(%arg0: i32, %arg1: i32, %arg2: memref<8x256xf32, #tpu.memory_space<vmem>>, %arg3: memref<8x256xf32, #tpu.memory_space<vmem>>, %arg4: memref<8x128xf32, #tpu.memory_space<vmem>>, %arg5: memref<8x128xf32, #tpu.memory_space<vmem>>, %arg6: memref<8x1xf32, #tpu.memory_space<vmem>>, %arg7: memref<8x1xf32, #tpu.memory_space<vmem>>, %arg8: memref<8x1xf32, #tpu.memory_space<vmem>>, %arg9: memref<8x1xf32, #tpu.memory_space<vmem>>) attributes {dimension_semantics = [#tpu.dimension_semantics<parallel>, #tpu.dimension_semantics<arbitrary>], iteration_bounds = array<i64: 1, 1>, scalar_prefetch = 0 : i64, scratch_operands = 2 : i64, tpu.core_type = #tpu.core_type<tc>, window_params = [{transform_indices = @transform_0, window_bounds = array<i64: 8, 256>}, {transform_indices = @transform_1, window_bounds = array<i64: 8, 256>}, {transform_indices = @transform_2, window_bounds = array<i64: 8, 128>}, {transform_indices = @transform_3, window_bounds = array<i64: 8, 128>}, {transform_indices = @transform_4, window_bounds = array<i64: 8, 1>}, {transform_indices = @transform_5, window_bounds = array<i64: 8, 1>}]} {
    %c0_i32 = arith.constant 0 : i32
    %0 = arith.cmpi eq, %arg1, %c0_i32 : i32
    %1 = arith.extui %0 : i1 to i32
    %c0_i32_0 = arith.constant 0 : i32
    %2 = arith.cmpi ne, %1, %c0_i32_0 : i32
    scf.if %2 {
      %cst_16 = arith.constant 0.000000e+00 : f32
      %26 = vector.broadcast %cst_16 : f32 to vector<8x1xf32>
      %c0_17 = arith.constant 0 : index
      %c0_18 = arith.constant 0 : index
      %27 = vector.load %arg8[%c0_17, %c0_18] : memref<8x1xf32, #tpu.memory_space<vmem>>, vector<8x1xf32>
      tpu.vector_store %arg8[%c0_17, %c0_18], %26 {strides = array<i32>} : memref<8x1xf32, #tpu.memory_space<vmem>>, vector<8x1xf32>,
      %cst_19 = arith.constant 0.000000e+00 : f32
      %28 = vector.broadcast %cst_19 : f32 to vector<8x1xf32>
      %c0_20 = arith.constant 0 : index
      %c0_21 = arith.constant 0 : index
      %29 = vector.load %arg9[%c0_20, %c0_21] : memref<8x1xf32, #tpu.memory_space<vmem>>, vector<8x1xf32>
      tpu.vector_store %arg9[%c0_20, %c0_21], %28 {strides = array<i32>} : memref<8x1xf32, #tpu.memory_space<vmem>>, vector<8x1xf32>,
    } else {
    }
    %c0 = arith.constant 0 : index
    %c0_1 = arith.constant 0 : index
    %3 = vector.load %arg2[%c0, %c0_1] : memref<8x256xf32, #tpu.memory_space<vmem>>, vector<8x256xf32>
    %4 = arith.negf %3 : vector<8x256xf32>
    %5 = math.exp %4 : vector<8x256xf32>
    %cst = arith.constant 1.000000e+00 : f32
    %6 = vector.broadcast %cst : f32 to vector<8x256xf32>
    %7 = arith.addf %6, %5 : vector<8x256xf32>
    %8 = arith.divf %6, %7 : vector<8x256xf32>
    %c0_2 = arith.constant 0 : index
    %c0_3 = arith.constant 0 : index
    %9 = vector.load %arg3[%c0_2, %c0_3] : memref<8x256xf32, #tpu.memory_space<vmem>>, vector<8x256xf32>
    %10 = arith.subf %9, %8 : vector<8x256xf32>
    %c0_4 = arith.constant 0 : index
    %c0_5 = arith.constant 0 : index
    %11 = vector.load %arg8[%c0_4, %c0_5] : memref<8x1xf32, #tpu.memory_space<vmem>>, vector<8x1xf32>
    %12 = arith.mulf %9, %8 : vector<8x256xf32>
    %cst_6 = arith.constant dense<0.000000e+00> : vector<8xf32>
    %13 = vector.multi_reduction <add>, %12, %cst_6 [1] : vector<8x256xf32> to vector<8xf32>
    %14 = vector.shape_cast %13 : vector<8xf32> to vector<8x1xf32>
    %15 = arith.addf %11, %14 : vector<8x1xf32>
    %c0_7 = arith.constant 0 : index
    %c0_8 = arith.constant 0 : index
    %16 = vector.load %arg8[%c0_7, %c0_8] : memref<8x1xf32, #tpu.memory_space<vmem>>, vector<8x1xf32>
    tpu.vector_store %arg8[%c0_7, %c0_8], %15 {strides = array<i32>} : memref<8x1xf32, #tpu.memory_space<vmem>>, vector<8x1xf32>,
    %c0_9 = arith.constant 0 : index
    %c0_10 = arith.constant 0 : index
    %17 = vector.load %arg9[%c0_9, %c0_10] : memref<8x1xf32, #tpu.memory_space<vmem>>, vector<8x1xf32>
    %18 = arith.mulf %10, %10 : vector<8x256xf32>
    %cst_11 = arith.constant dense<0.000000e+00> : vector<8xf32>
    %19 = vector.multi_reduction <add>, %18, %cst_11 [1] : vector<8x256xf32> to vector<8xf32>
    %20 = vector.shape_cast %19 : vector<8xf32> to vector<8x1xf32>
    %21 = arith.addf %17, %20 : vector<8x1xf32>
    %c0_12 = arith.constant 0 : index
    %c0_13 = arith.constant 0 : index
    %22 = vector.load %arg9[%c0_12, %c0_13] : memref<8x1xf32, #tpu.memory_space<vmem>>, vector<8x1xf32>
    tpu.vector_store %arg9[%c0_12, %c0_13], %21 {strides = array<i32>} : memref<8x1xf32, #tpu.memory_space<vmem>>, vector<8x1xf32>,
    %c0_i32_14 = arith.constant 0 : i32
    %23 = arith.cmpi eq, %arg1, %c0_i32_14 : i32
    %24 = arith.extui %23 : i1 to i32
    %c0_i32_15 = arith.constant 0 : i32
    %25 = arith.cmpi ne, %24, %c0_i32_15 : i32
    scf.if %25 {
      %c0_16 = arith.constant 0 : index
      %c0_17 = arith.constant 0 : index
      %26 = vector.load %arg8[%c0_16, %c0_17] : memref<8x1xf32, #tpu.memory_space<vmem>>, vector<8x1xf32>
      %cst_18 = arith.constant 9.99999997E-7 : f32
      %27 = vector.broadcast %cst_18 : f32 to vector<8x1xf32>
      %28 = arith.addf %26, %27 : vector<8x1xf32>
      %c0_19 = arith.constant 0 : index
      %c0_20 = arith.constant 0 : index
      %29 = vector.load %arg9[%c0_19, %c0_20] : memref<8x1xf32, #tpu.memory_space<vmem>>, vector<8x1xf32>
      %30 = arith.addf %26, %29 : vector<8x1xf32>
      %cst_21 = arith.constant 9.99999997E-7 : f32
      %31 = vector.broadcast %cst_21 : f32 to vector<8x1xf32>
      %32 = arith.addf %30, %31 : vector<8x1xf32>
      %33 = arith.divf %28, %32 : vector<8x1xf32>
      %c0_22 = arith.constant 0 : index
      %c0_23 = arith.constant 0 : index
      %34 = vector.load %arg6[%c0_22, %c0_23] : memref<8x1xf32, #tpu.memory_space<vmem>>, vector<8x1xf32>
      tpu.vector_store %arg6[%c0_22, %c0_23], %33 {strides = array<i32>} : memref<8x1xf32, #tpu.memory_space<vmem>>, vector<8x1xf32>,
      %c0_24 = arith.constant 0 : index
      %c0_25 = arith.constant 0 : index
      %35 = vector.load %arg4[%c0_24, %c0_25] : memref<8x128xf32, #tpu.memory_space<vmem>>, vector<8x128xf32>
      %36 = math.tanh %35 : vector<8x128xf32>
      %c0_26 = arith.constant 0 : index
      %c0_27 = arith.constant 0 : index
      %37 = vector.load %arg5[%c0_26, %c0_27] : memref<8x128xf32, #tpu.memory_space<vmem>>, vector<8x128xf32>
      %38 = arith.subf %36, %37 : vector<8x128xf32>
      %39 = math.absf %38 : vector<8x128xf32>
      %cst_28 = arith.constant dense<0.000000e+00> : vector<8xf32>
      %40 = vector.multi_reduction <add>, %39, %cst_28 [1] : vector<8x128xf32> to vector<8xf32>
      %41 = vector.shape_cast %40 : vector<8xf32> to vector<8x1xf32>
      %c0_29 = arith.constant 0 : index
      %c0_30 = arith.constant 0 : index
      %42 = vector.load %arg7[%c0_29, %c0_30] : memref<8x1xf32, #tpu.memory_space<vmem>>, vector<8x1xf32>
      tpu.vector_store %arg7[%c0_29, %c0_30], %41 {strides = array<i32>} : memref<8x1xf32, #tpu.memory_space<vmem>>, vector<8x1xf32>,
    } else {
    }
    return
  }
  func.func @transform_0(%arg0: i32, %arg1: i32) -> (i32, i32) {
    %c0_i32 = arith.constant 0 : i32
    return %arg0, %arg1 : i32, i32
  }
  func.func @transform_1(%arg0: i32, %arg1: i32) -> (i32, i32) {
    %c0_i32 = arith.constant 0 : i32
    return %arg0, %arg1 : i32, i32
  }
  func.func @transform_2(%arg0: i32, %arg1: i32) -> (i32, i32) {
    %c0_i32 = arith.constant 0 : i32
    %c0_i32_0 = arith.constant 0 : i32
    return %arg0, %c0_i32 : i32, i32
  }
  func.func @transform_3(%arg0: i32, %arg1: i32) -> (i32, i32) {
    %c0_i32 = arith.constant 0 : i32
    %c0_i32_0 = arith.constant 0 : i32
    return %arg0, %c0_i32 : i32, i32
  }
  func.func @transform_4(%arg0: i32, %arg1: i32) -> (i32, i32) {
    %c0_i32 = arith.constant 0 : i32
    %c0_i32_0 = arith.constant 0 : i32
    return %arg0, %c0_i32 : i32, i32
  }
  func.func @transform_5(%arg0: i32, %arg1: i32) -> (i32, i32) {
    %c0_i32 = arith.constant 0 : i32
    %c0_i32_0 = arith.constant 0 : i32
    return %arg0, %c0_i32 : i32, i32
  }
}

</mosaic_0001>

<bundles_post_ra>
// kernel: joint_loss.1
= control target key start
LH: loop header
LB: loop body
LE: loop exit
PB: predicated region body
PF: predicated region fallthrough
CT: control target
= control target key end

     0   :  { %vm23_vm0 = vcmask 7168   ;;  %v103_v2 = vmov 0.0   ;;  %s164_s0 = inlined_call_operand.vmem [shape: f32[8,256], index: 0, kind: input, shape index: {}]   ;;  %s165_s2 = inlined_call_operand.vmem [shape: f32[8,128], index: 2, kind: input, shape index: {}]   ;;  %s166_s3 = inlined_call_operand.vmem [shape: f32[8,128], index: 3, kind: input, shape index: {}]   ;;  %s167_s1 = inlined_call_operand.vmem [shape: f32[8,256], index: 1, kind: input, shape index: {}]   ;;  %s168_s5 = inlined_call_operand.vmem [shape: f32[8,1], index: 5, kind: output, shape index: {1}]   ;;  %s169_s4 = inlined_call_operand.vmem [shape: f32[8,1], index: 4, kind: output, shape index: {0}]  }
   0x1   :  { %v26_v0 = vld [vmem:[%s164_s0] sm:$0xff]  ;;  %v27_v1 = vld [vmem:[%s164_s0 + $0x8] sm:$0xff]  ;;  %24 = vst.msk [vmem:[#allocation2] sm:$0xff] %vm23_vm0, %v103_v2  ;;  %25 = vst.msk [vmem:[#allocation3] sm:$0xff] %vm23_vm0, %v103_v2 }
   0x2   :  { %v88_v3 = vmul.f32 -1.442695, %v26_v0  ;;  %v89_v4 = vmul.f32 -1.442695, %v27_v1  ;;  %v72_v5 = vld [vmem:[%s165_s2] sm:$0xff]  ;;  %v41_v15 = vld [vmem:[%s167_s1 + $0x8] sm:$0xff] }
   0x3   :  { %91 = vtanh.f32 %v72_v5  ;;  %v74_v6 = vld [vmem:[%s166_s3] sm:$0xff] }
   0x4   :  { %93 = vpow2.f32 %v88_v3  ;;  %v40_v14 = vld [vmem:[%s167_s1] sm:$0xff] }
   0x5   :  { %95 = vpow2.f32 %v89_v4 }
   0x8   :  { %v44_v27 = vld [vmem:[#allocation2] sm:$0xff]  ;;  %v53_v30 = vld [vmem:[#allocation3] sm:$0xff] }
  0x10   :  { %v92_v7 = vpop.eup %91 }
  0x11   :  { %v94_v8 = vpop.eup %93  ;;  %v75_v9 = vsub.f32 %v92_v7, %v74_v6 }
  0x12   :  { %v96_v10 = vpop.eup %95  ;;  %v34_v11 = vadd.f32 1.0, %v94_v8 }
  0x13   :  { %v35_v12 = vadd.f32 1.0, %v96_v10  ;;  %v76_v13 = vand.u32 2147483647, %v75_v9 }
  0x14   :  { %97 = vrcp.f32 %v34_v11 }
  0x15   :  { %99 = vrcp.f32 %v35_v12  ;;  %77 = vadd.xlane.f32.xlu1 %v76_v13 }
  0x21   :  { %v98_v16 = vpop.eup %97 }
  0x22   :  { %v100_v17 = vpop.eup %99  ;;  %v45_v18 = vmul.f32 %v98_v16, %v40_v14  ;;  %v42_v19 = vsub.f32 %v40_v14, %v98_v16 }
  0x23   :  { %v46_v20 = vmul.f32 %v100_v17, %v41_v15  ;;  %v43_v21 = vsub.f32 %v41_v15, %v100_v17 }
  0x24   :  { %v54_v22 = vmul.f32 %v42_v19, %v42_v19 }
  0x25   :  { %v47_v23 = vadd.f32 %v46_v20, %v45_v18  ;;  %v55_v24 = vmul.f32 %v43_v21, %v43_v21 }
  0x27   :  { %48 = vadd.xlane.f32.xlu0 %v47_v23  ;;  %v56_v25 = vadd.f32 %v55_v24, %v54_v22 }
  0x2b   :  { %57 = vadd.xlane.f32.xlu0 %v56_v25 }
  0x9e   :  { %v78_v26 = vpop.xlane.xlu1 %77 }
  0x9f   :  { %79 = vst.msk [vmem:[%s168_s5] sm:$0xff] %vm23_vm0, %v78_v26 }
  0xb0   :  { %v49_v28 = vpop.xlane.xlu0 %48 }
  0xb1   :  { %v50_v29 = vadd.f32 %v49_v28, %v44_v27 }
  0xb3   :  { %52 = vst.msk [vmem:[#allocation2] sm:$0xff] %vm23_vm0, %v50_v29 }
  0xb4   :  { %v58_v31 = vpop.xlane.xlu0 %57 }
  0xb5   :  { %v59_v32 = vadd.f32 %v58_v31, %v53_v30 }
  0xb7   :  { %60 = vst.msk [vmem:[#allocation3] sm:$0xff] %vm23_vm0, %v59_v32 }
  0xba   :  { %v64_v33 = vld [vmem:[#allocation2] sm:$0xff] }
  0xbb   :  { %v65_v37 = vadd.f32 1e-06, %v64_v33 }
  0xbe   :  { %v66_v34 = vld [vmem:[#allocation3] sm:$0xff] }
  0xbf   :  { %v67_v35 = vadd.f32 %v66_v34, %v64_v33 }
  0xc1   :  { %v68_v36 = vadd.f32 1e-06, %v67_v35 }
  0xc3   :  { %101 = vrcp.f32 %v68_v36 }
  0xd0   :  { %v102_v38 = vpop.eup %101 }
  0xd1   :  { %v70_v39 = vmul.f32 %v102_v38, %v65_v37 }
  0xd3   :  { %71 = vst.msk [vmem:[%s169_s4] sm:$0xff] %vm23_vm0, %v70_v39 }

</bundles_post_ra>
